<compile_context>
chip_gen: v6e
topology: v6e:2x2x1
jax: 0.10.0
libtpu: 0.0.40
codegen_flags: <defaults>
</compile_context>

<pallas_src>
import functools
import math

import jax
import jax.numpy as jnp
from jax import lax
from jax.experimental import pallas as pl
from jax.experimental.pallas import tpu as pltpu

_SUBLANE = 8
_LANE = 128
_TILE_M = 512                          # row tile for A_hat @ XW and H @ H^T
_XW_RESIDENT_BYTES = 8 * 1024 * 1024   # keep XW fully resident in VMEM below this
_VMEM_LIMIT = 48 * 1024 * 1024         # < v7x 64 MiB physical, > v5e 16 MiB scoped default


def _round_up(x, m):
    return ((x + m - 1) // m) * m


# ----------------------------------------------------------------------------
# Pallas kernels
# ----------------------------------------------------------------------------
def _xw_kernel(x_ref, w_ref, o_ref):
    """Row-tiled dense projection:  o = X_block @ W (emitted in adjacency dtype)."""
    o_ref[...] = jnp.dot(
        x_ref[...], w_ref[...], preferred_element_type=jnp.float32
    ).astype(o_ref.dtype)


def _a_propagate_kernel(a_ref, xw_ref, b_ref, m_ref, o_ref, *, tile_k, resident):
    """Tiled propagation:  Y = A_hat @ XW + b, per-column ReLU mask.

    Accumulates directly into the resident f32 output block (no scratch);
    bias + masked ReLU only in the epilogue (single lane-dense writeback).
    """
    k = pl.program_id(1)
    if resident:
        start = pl.multiple_of(k * tile_k, tile_k)
        xw = xw_ref[pl.ds(start, tile_k), :]
    else:
        xw = xw_ref[...]
    contrib = jnp.dot(a_ref[...], xw, preferred_element_type=jnp.float32)

    @pl.when(k == 0)
    def _():
        o_ref[...] = contrib

    @pl.when(k != 0)
    def _():
        o_ref[...] = o_ref[...] + contrib

    @pl.when(k == pl.num_programs(1) - 1)
    def _():
        y = o_ref[...] + b_ref[...]
        o_ref[...] = jnp.where(m_ref[...] > 0.5, jnp.maximum(y, 0.0), y)


def _dot_decoder_kernel(hl_ref, hr_ref, o_ref):
    """Structure reconstruction tile:  S[i,j] = H_i @ H_j^T (sigmoid_s=False)."""
    o_ref[...] = lax.dot_general(
        hl_ref[...], hr_ref[...],
        dimension_numbers=(((1,), (1,)), ((), ())),
        preferred_element_type=jnp.float32,
    ).astype(o_ref.dtype)


# ----------------------------------------------------------------------------
# pallas_call wrappers
# ----------------------------------------------------------------------------
def xw_matmul(x, w, out_dtype=jnp.float32):
    """XW = X @ W, row-tiled (feature dims stay whole along the lane axis)."""
    m, f_in = x.shape
    f_out = w.shape[1]
    tile = _TILE_M if m >= _TILE_M else _round_up(m, _SUBLANE)
    m_pad = _round_up(m, tile)
    xp = x if m_pad == m else jnp.pad(x, ((0, m_pad - m), (0, 0)))
    out = pl.pallas_call(
        _xw_kernel,
        out_shape=jax.ShapeDtypeStruct((m_pad, f_out), out_dtype),
        grid_spec=pltpu.PrefetchScalarGridSpec(
            num_scalar_prefetch=0,
            grid=(m_pad // tile,),
            in_specs=[
                pl.BlockSpec((tile, f_in), lambda i: (i, 0)),
                pl.BlockSpec((f_in, f_out), lambda i: (0, 0)),
            ],
            out_specs=pl.BlockSpec((tile, f_out), lambda i: (i, 0)),
        ),
        compiler_params=pltpu.CompilerParams(
            dimension_semantics=("parallel",)),
    )(xp, w)
    return out if m_pad == m else out[:m]


def _choose_tiles(n_pad):
    """Row tile / rectangular contraction tile for the A_hat @ XW matmul."""
    if n_pad <= _TILE_M:
        return n_pad, n_pad
    tile_k = _TILE_M
    for cand in (2048, 1024):          # bigger contraction tile amortizes step overhead
        if n_pad % cand == 0:
            tile_k = cand
            break
    return _TILE_M, tile_k


def a_propagate(a_pad, xw, b, relu_mask):
    """Y = A_hat @ XW + b (per-column masked ReLU).  a_pad is (Np, Np), xw (Np, f)."""
    n_pad = a_pad.shape[0]
    f = xw.shape[1]
    tile_m, tile_k = _choose_tiles(n_pad)
    resident = n_pad * f * xw.dtype.itemsize <= _XW_RESIDENT_BYTES
    if resident:
        xw_spec = pl.BlockSpec((n_pad, f), lambda i, k: (0, 0))   # DMA'd once, sliced in-kernel
    else:
        xw_spec = pl.BlockSpec((tile_k, f), lambda i, k: (k, 0))
    b2 = b.reshape(1, f).astype(jnp.float32)
    m2 = relu_mask.reshape(1, f).astype(jnp.float32)
    return pl.pallas_call(
        functools.partial(_a_propagate_kernel, tile_k=tile_k, resident=resident),
        out_shape=jax.ShapeDtypeStruct((n_pad, f), jnp.float32),
        grid_spec=pltpu.PrefetchScalarGridSpec(
            num_scalar_prefetch=0,
            grid=(n_pad // tile_m, n_pad // tile_k),
            in_specs=[
                pl.BlockSpec((tile_m, tile_k), lambda i, k: (i, k)),
                xw_spec,
                pl.BlockSpec((1, f), lambda i, k: (0, 0)),
                pl.BlockSpec((1, f), lambda i, k: (0, 0)),
            ],
            out_specs=pl.BlockSpec((tile_m, f), lambda i, k: (i, 0)),
        ),
        compiler_params=pltpu.CompilerParams(
            dimension_semantics=("parallel", "arbitrary"),
            vmem_limit_bytes=_VMEM_LIMIT),
    )(a_pad, xw, b2, m2)


def dot_decoder(h_pad, n):
    """S = H @ H.T.  h_pad has Np (padded) rows; only rows/cols < n are emitted."""
    n_pad, d = h_pad.shape
    if n_pad <= _TILE_M:
        tile, out_n = n_pad, n_pad         # single full block; crop below if needed
    else:
        tile, out_n = _TILE_M, n           # edge blocks masked on write: no N^2 crop copy
    out = pl.pallas_call(
        _dot_decoder_kernel,
        out_shape=jax.ShapeDtypeStruct((out_n, out_n), jnp.float32),
        grid_spec=pltpu.PrefetchScalarGridSpec(
            num_scalar_prefetch=0,
            grid=(pl.cdiv(out_n, tile), pl.cdiv(out_n, tile)),
            in_specs=[
                pl.BlockSpec((tile, d), lambda i, j: (i, 0)),
                pl.BlockSpec((tile, d), lambda i, j: (j, 0)),
            ],
            out_specs=pl.BlockSpec((tile, tile), lambda i, j: (i, j)),
        ),
        compiler_params=pltpu.CompilerParams(
            dimension_semantics=("parallel", "parallel"),
            vmem_limit_bytes=_VMEM_LIMIT),
    )(h_pad, h_pad)
    return out if out_n == n else out[:n, :n]


# ----------------------------------------------------------------------------
# Branch-batched GCN layers (share each A_hat stream across stacks/branches)
# ----------------------------------------------------------------------------
def gcn_layer_batched(a_pad, groups):
    """One GCN layer for several (W, b, branches, relu) groups in a single
    A_hat propagation pass.  Branch outputs are lane-concatenated and padded to
    a multiple of 128 lanes (lane-dense loads/stores); ReLU is applied per
    column group via a mask in the epilogue."""
    n_pad = a_pad.shape[0]
    adj_dtype = a_pad.dtype
    xw_cols, biases, masks, widths = [], [], [], []
    for w, b, xs, relu in groups:
        f_out = w.shape[1]
        for xb in xs:
            xw_cols.append(xw_matmul(xb, w, out_dtype=adj_dtype))
            biases.append(b.astype(jnp.float32))
            masks.append(jnp.full((f_out,), 1.0 if relu else 0.0, jnp.float32))
            widths.append(f_out)
    f_total = sum(widths)
    f_pad = _round_up(max(f_total, _LANE), _LANE)
    if f_pad > f_total:
        pad = f_pad - f_total
        xw_cols.append(jnp.zeros((n_pad, pad), adj_dtype))
        biases.append(jnp.zeros((pad,), jnp.float32))
        masks.append(jnp.zeros((pad,), jnp.float32))
    xw_cat = xw_cols[0] if len(xw_cols) == 1 else jnp.concatenate(xw_cols, axis=1)
    b_cat = biases[0] if len(biases) == 1 else jnp.concatenate(biases)
    m_cat = masks[0] if len(masks) == 1 else jnp.concatenate(masks)
    y = a_propagate(a_pad, xw_cat, b_cat, m_cat)
    outs, off = [], 0
    for f_out in widths:
        outs.append(y[:, off:off + f_out])
        off += f_out
    return outs


def gcn_stacks_apply(a_pad, stacks):
    """Apply several GCN stacks (possibly with different depths and several
    input branches each) layer-by-layer, fusing every layer's A_hat pass across
    all stacks/branches.  stacks: list of (params_list, [x_branch, ...]) with
    Np-padded rows.  Returns a list (per stack) of lists (per branch)."""
    depths = [len(p) for p, _ in stacks]
    states = [list(xs) for _, xs in stacks]
    for layer in range(max(depths)):
        groups, idx = [], []
        for si, (p, _) in enumerate(stacks):
            if layer < depths[si]:
                relu = layer < depths[si] - 1   # ReLU between layers, not after the last
                groups.append((p[layer][0], p[layer][1], states[si], relu))
                idx.append(si)
        outs = gcn_layer_batched(a_pad, groups)
        off = 0
        for si in idx:
            nb = len(states[si])
            states[si] = outs[off:off + nb]
            off += nb
    return states


# ----------------------------------------------------------------------------
# Model glue (parameter setup, adjacency, forward wiring)
# ----------------------------------------------------------------------------
def _glorot(key, fan_in, fan_out):
    lim = math.sqrt(6.0 / (fan_in + fan_out))
    return jax.random.uniform(key, (fan_in, fan_out), jnp.float32, -lim, lim)


def _init_gcn(key, dims):
    """PyG-style GCN stack: weights glorot-uniform, biases zero."""
    params = []
    for i in range(len(dims) - 1):
        key, sub = jax.random.split(key)
        params.append((_glorot(sub, dims[i], dims[i + 1]),
                       jnp.zeros((dims[i + 1],), jnp.float32)))
    return params, key


def init_dominant(key, in_dim, hid_dim=64, num_layers=4):
    assert num_layers >= 2
    enc_layers = num_layers // 2            # floor
    dec_layers = math.ceil(num_layers / 2)  # ceil
    enc_dims = [in_dim] + [hid_dim] * (enc_layers - 1) + [hid_dim]
    dec_dims = [hid_dim // 2] + [hid_dim] * (dec_layers - 1) + [in_dim]
    struct_dims = [hid_dim // 2] + [hid_dim] * max(dec_layers - 2, 0) + [hid_dim]
    p_enc, key = _init_gcn(key, enc_dims)
    p_dec1, key = _init_gcn(key, dec_dims)
    p_dec2, key = _init_gcn(key, dec_dims)
    p_struct, key = _init_gcn(key, struct_dims)
    return {"enc": p_enc, "dec1": p_dec1, "dec2": p_dec2, "struct": p_struct}


def normalized_adj(edge_index, n):
    """Dense A_hat = D^-1/2 (A + I) D^-1/2 (gcn_norm for a symmetric edge set).
    NOTE: duplicate edges are deduplicated here; PyG's scatter-add would count
    multiplicity (reference below uses the same dense A, so they agree)."""
    src, dst = edge_index[0], edge_index[1]
    a = jnp.zeros((n, n), jnp.float32).at[dst, src].set(1.0)
    a = a + jnp.eye(n, dtype=jnp.float32)
    deg = a.sum(axis=1)
    d_inv_sqrt = jnp.where(deg > 0, 1.0 / jnp.sqrt(deg), 0.0)
    return d_inv_sqrt[:, None] * a * d_inv_sqrt[None, :]


def pad_adj(a_hat, dtype):
    """Pad A_hat once to a tile multiple and cast to the streaming dtype."""
    n = a_hat.shape[0]
    n_pad = _round_up(n, _TILE_M) if n >= _TILE_M else _round_up(n, _SUBLANE)
    a = a_hat.astype(dtype)
    if n_pad != n:
        a = jnp.pad(a, ((0, n_pad - n), (0, n_pad - n)))
    return a


def _pad_rows(x, n_pad):
    return x if x.shape[0] == n_pad else jnp.pad(x, ((0, n_pad - x.shape[0]), (0, 0)))


def flip_sensitive_attributes(x, sens_idx):
    # TODO(synk): flip_sensitive_attributes source unavailable; assumed binary
    # flip of the sensitive column: x[:, sens_idx] -> 1 - x[:, sens_idx].
    return x.at[:, sens_idx].set(1.0 - x[:, sens_idx])


def dominant_forward(params, x, a_hat, adj_dtype=jnp.bfloat16):
    """Mirrors DOMINANTBase.forward; returns (z_s, z_ns, x_s_hat, x_ns_hat,
    x_s_cf_hat, s_).  adj_dtype=bfloat16 (default) halves A_hat HBM/VMEM
    traffic and uses the bf16 MXU rate; accumulation stays f32.  Pass
    adj_dtype=jnp.float32 for exact f32 propagation."""
    n = x.shape[0]
    a_pad = pad_adj(a_hat, adj_dtype)
    n_pad = a_pad.shape[0]

    x_cf = flip_sensitive_attributes(x, 0)
    xp, x_cf_p = _pad_rows(x, n_pad), _pad_rows(x_cf, n_pad)

    # Encoder: main + counterfactual branches share weights and A_hat streams.
    (z_p, z_cf_p), = gcn_stacks_apply(a_pad, [(params["enc"], [xp, x_cf_p])])

    half = z_p.shape[1] // 2
    z_s_p, z_ns_p = z_p[:, :half], z_p[:, half:]
    z_s_cf_p, z_ns_cf_p = z_cf_p[:, :half], z_cf_p[:, half:]

    # Both attribute decoders (both branches) + the structure-decoder GCN share
    # each A_hat layer pass (5 -> 4 full A_hat streams per forward).
    dec_out = gcn_stacks_apply(
        a_pad,
        [(params["dec1"], [z_s_p, z_s_cf_p]),
         (params["dec2"], [z_ns_p, z_ns_cf_p]),
         (params["struct"], [z_ns_p])])
    x_s_hat_p, x_s_cf_hat_p = dec_out[0]
    x_ns_hat_p, _x_ns_cf_hat_p = dec_out[1]   # computed (as in torch) but not returned
    (h_struct_p,) = dec_out[2]

    s_ = dot_decoder(h_struct_p, n)           # sigmoid_s=False
    return (z_s_p[:n], z_ns_p[:n], x_s_hat_p[:n], x_ns_hat_p[:n],
            x_s_cf_hat_p[:n], s_)


# ----------------------------------------------------------------------------
# Plain-JAX reference (same math, no Pallas / no batching) for correctness.
# ----------------------------------------------------------------------------
def _ref_apply(params, a_hat, x):
    h = x
    for i, (w, b) in enumerate(params):
        h = a_hat @ (h @ w) + b
        if i < len(params) - 1:
            h = jnp.maximum(h, 0.0)
    return h


def dominant_forward_ref(params, x, a_hat):
    z = _ref_apply(params["enc"], a_hat, x)
    x_cf = flip_sensitive_attributes(x, 0)
    z_cf = _ref_apply(params["enc"], a_hat, x_cf)
    half = z.shape[1] // 2
    z_s, z_ns = z[:, :half], z[:, half:]
    z_s_cf, z_ns_cf = z_cf[:, :half], z_cf[:, half:]
    x_s_hat = _ref_apply(params["dec1"], a_hat, z_s)
    x_ns_hat = _ref_apply(params["dec2"], a_hat, z_ns)
    x_s_cf_hat = _ref_apply(params["dec1"], a_hat, z_s_cf)
    _ = _ref_apply(params["dec2"], a_hat, z_ns_cf)
    h_struct = _ref_apply(params["struct"], a_hat, z_ns)
    s_ = h_struct @ h_struct.T
    return z_s, z_ns, x_s_hat, x_ns_hat, x_s_cf_hat, s_


# ----------------------------------------------------------------------------
if __name__ == "__main__":
    def build_graph(key, n, in_dim, e):
        k_x, k_s, k_src, k_dst = jax.random.split(key, 4)
        x = jax.random.normal(k_x, (n, in_dim), jnp.float32)
        # Column 0 is the binary sensitive attribute (counterfactual flip).
        x = x.at[:, 0].set(jax.random.bernoulli(k_s, 0.5, (n,)).astype(jnp.float32))
        src = jax.random.randint(k_src, (e,), 0, n)
        dst = jax.random.randint(k_dst, (e,), 0, n)
        edge_index = jnp.stack([jnp.concatenate([src, dst]),
                                jnp.concatenate([dst, src])]).astype(jnp.int32)
        return x, edge_index

    key = jax.random.PRNGKey(0)
    k_g1, k_p1, k_g2, k_p2 = jax.random.split(key, 4)
    fwd_f32 = jax.jit(functools.partial(dominant_forward, adj_dtype=jnp.float32))
    fwd_bf16 = jax.jit(dominant_forward)   # default: bf16 A_hat / XW streaming

    # -- small case (toy shapes, single-tile grids), exact f32 path ----------
    N, IN_DIM, HID_DIM, NUM_LAYERS, E = 16, 8, 32, 4, 24
    x, edge_index = build_graph(k_g1, N, IN_DIM, E)
    params = init_dominant(k_p1, IN_DIM, HID_DIM, NUM_LAYERS)
    a_hat = normalized_adj(edge_index, N)
    outs = jax.block_until_ready(fwd_f32(params, x, a_hat))
    refs = dominant_forward_ref(params, x, a_hat)
    for o, r in zip(outs, refs):
        assert o.shape == r.shape and o.dtype == jnp.float32
        assert float(jnp.max(jnp.abs(o - r))) < 1e-4

    # -- larger case: multi-tile grid, rectangular tiles, padding, edge masks -
    N2, IN2, HID2, L2, E2 = 640, 12, 64, 4, 2000
    x2, ei2 = build_graph(k_g2, N2, IN2, E2)
    params2 = init_dominant(k_p2, IN2, HID2, L2)
    a_hat2 = normalized_adj(ei2, N2)
    refs2 = dominant_forward_ref(params2, x2, a_hat2)

    outs2 = jax.block_until_ready(fwd_f32(params2, x2, a_hat2))
    for o, r in zip(outs2, refs2):
        assert o.shape == r.shape
        tol = 1e-3 * (1.0 + float(jnp.max(jnp.abs(r))))
        assert float(jnp.max(jnp.abs(o - r))) < tol

    # -- default bf16-adjacency path (half A_hat HBM traffic, bf16 MXU rate) -
    outs_bf = jax.block_until_ready(fwd_bf16(params2, x2, a_hat2))
    for o, r in zip(outs_bf, refs2):
        assert o.shape == r.shape
        tol = 5e-2 * (1.0 + float(jnp.max(jnp.abs(r))))
        assert float(jnp.max(jnp.abs(o - r))) < tol

    # -- exercise the non-resident-XW fallback path explicitly ---------------
    _saved = _XW_RESIDENT_BYTES
    _XW_RESIDENT_BYTES = 0
    outs_fb = jax.block_until_ready(
        jax.jit(functools.partial(dominant_forward, adj_dtype=jnp.float32))(
            params2, x2, a_hat2))
    _XW_RESIDENT_BYTES = _saved
    for o, r in zip(outs_fb, refs2):
        tol = 1e-3 * (1.0 + float(jnp.max(jnp.abs(r))))
        assert float(jnp.max(jnp.abs(o - r))) < tol

    print("KERNEL_OK")
</pallas_src>

<mosaic_0001>
module attributes {stable_mosaic.version = 11 : i64} {
  func.func @_xw_kernel(%arg0: i32, %arg1: memref<16x8xf32, #tpu.memory_space<vmem>>, %arg2: memref<8x32xf32, #tpu.memory_space<vmem>>, %arg3: memref<16x32xf32, #tpu.memory_space<vmem>>) attributes {dimension_semantics = [#tpu.dimension_semantics<parallel>], iteration_bounds = array<i64: 1>, scalar_prefetch = 0 : i64, scratch_operands = 0 : i64, tpu.core_type = #tpu.core_type<tc>, window_params = [{transform_indices = @transform_0, window_bounds = array<i64: 16, 8>}, {pipeline_mode = #tpu.pipeline_mode<synchronous>, transform_indices = @transform_1, window_bounds = array<i64: 8, 32>}, {transform_indices = @transform_2, window_bounds = array<i64: 16, 32>}]} {
    %c0 = arith.constant 0 : index
    %c0_0 = arith.constant 0 : index
    %0 = vector.load %arg1[%c0, %c0_0] : memref<16x8xf32, #tpu.memory_space<vmem>>, vector<16x8xf32>
    %c0_1 = arith.constant 0 : index
    %c0_2 = arith.constant 0 : index
    %1 = vector.load %arg2[%c0_1, %c0_2] : memref<8x32xf32, #tpu.memory_space<vmem>>, vector<8x32xf32>
    %cst = arith.constant dense<0.000000e+00> : vector<16x32xf32>
    %2 = tpu.matmul %0, %1, %cst {dimension_numbers = #tpu.dot_dimension_numbers<[1], [0], [0], [1], [0, 0, 1, 1], [], []>} : vector<16x8xf32>, vector<8x32xf32>, vector<16x32xf32> -> vector<16x32xf32>
    %c0_3 = arith.constant 0 : index
    %c0_4 = arith.constant 0 : index
    %3 = vector.load %arg3[%c0_3, %c0_4] : memref<16x32xf32, #tpu.memory_space<vmem>>, vector<16x32xf32>
    tpu.vector_store %arg3[%c0_3, %c0_4], %2 {strides = array<i32>} : memref<16x32xf32, #tpu.memory_space<vmem>>, vector<16x32xf32>,
    return
  }
  func.func @transform_0(%arg0: i32) -> (i32, i32) {
    %c0_i32 = arith.constant 0 : i32
    %c0_i32_0 = arith.constant 0 : i32
    return %arg0, %c0_i32 : i32, i32
  }
  func.func @transform_1(%arg0: i32) -> (i32, i32) {
    %c0_i32 = arith.constant 0 : i32
    %c0_i32_0 = arith.constant 0 : i32
    %c0_i32_1 = arith.constant 0 : i32
    return %c0_i32, %c0_i32_0 : i32, i32
  }
  func.func @transform_2(%arg0: i32) -> (i32, i32) {
    %c0_i32 = arith.constant 0 : i32
    %c0_i32_0 = arith.constant 0 : i32
    return %arg0, %c0_i32 : i32, i32
  }
}

module attributes {stable_mosaic.version = 11 : i64} {
  func.func @_xw_kernel(%arg0: i32, %arg1: memref<16x32xf32, #tpu.memory_space<vmem>>, %arg2: memref<32x32xf32, #tpu.memory_space<vmem>>, %arg3: memref<16x32xf32, #tpu.memory_space<vmem>>) attributes {dimension_semantics = [#tpu.dimension_semantics<parallel>], iteration_bounds = array<i64: 1>, scalar_prefetch = 0 : i64, scratch_operands = 0 : i64, tpu.core_type = #tpu.core_type<tc>, window_params = [{transform_indices = @transform_0, window_bounds = array<i64: 16, 32>}, {pipeline_mode = #tpu.pipeline_mode<synchronous>, transform_indices = @transform_1, window_bounds = array<i64: 32, 32>}, {transform_indices = @transform_2, window_bounds = array<i64: 16, 32>}]} {
    %c0 = arith.constant 0 : index
    %c0_0 = arith.constant 0 : index
    %0 = vector.load %arg1[%c0, %c0_0] : memref<16x32xf32, #tpu.memory_space<vmem>>, vector<16x32xf32>
    %c0_1 = arith.constant 0 : index
    %c0_2 = arith.constant 0 : index
    %1 = vector.load %arg2[%c0_1, %c0_2] : memref<32x32xf32, #tpu.memory_space<vmem>>, vector<32x32xf32>
    %cst = arith.constant dense<0.000000e+00> : vector<16x32xf32>
    %2 = tpu.matmul %0, %1, %cst {dimension_numbers = #tpu.dot_dimension_numbers<[1], [0], [0], [1], [0, 0, 1, 1], [], []>} : vector<16x32xf32>, vector<32x32xf32>, vector<16x32xf32> -> vector<16x32xf32>
    %c0_3 = arith.constant 0 : index
    %c0_4 = arith.constant 0 : index
    %3 = vector.load %arg3[%c0_3, %c0_4] : memref<16x32xf32, #tpu.memory_space<vmem>>, vector<16x32xf32>
    tpu.vector_store %arg3[%c0_3, %c0_4], %2 {strides = array<i32>} : memref<16x32xf32, #tpu.memory_space<vmem>>, vector<16x32xf32>,
    return
  }
  func.func @transform_0(%arg0: i32) -> (i32, i32) {
    %c0_i32 = arith.constant 0 : i32
    %c0_i32_0 = arith.constant 0 : i32
    return %arg0, %c0_i32 : i32, i32
  }
  func.func @transform_1(%arg0: i32) -> (i32, i32) {
    %c0_i32 = arith.constant 0 : i32
    %c0_i32_0 = arith.constant 0 : i32
    %c0_i32_1 = arith.constant 0 : i32
    return %c0_i32, %c0_i32_0 : i32, i32
  }
  func.func @transform_2(%arg0: i32) -> (i32, i32) {
    %c0_i32 = arith.constant 0 : i32
    %c0_i32_0 = arith.constant 0 : i32
    return %arg0, %c0_i32 : i32, i32
  }
}

module attributes {stable_mosaic.version = 11 : i64} {
  func.func @_a_propagate_kernel(%arg0: i32, %arg1: i32, %arg2: memref<16x16xf32, #tpu.memory_space<vmem>>, %arg3: memref<16x128xf32, #tpu.memory_space<vmem>>, %arg4: memref<1x128xf32, #tpu.memory_space<vmem>>, %arg5: memref<1x128xf32, #tpu.memory_space<vmem>>, %arg6: memref<16x128xf32, #tpu.memory_space<vmem>>) attributes {dimension_semantics = [#tpu.dimension_semantics<parallel>, #tpu.dimension_semantics<arbitrary>], iteration_bounds = array<i64: 1, 1>, scalar_prefetch = 0 : i64, scratch_operands = 0 : i64, tpu.core_type = #tpu.core_type<tc>, window_params = [{transform_indices = @transform_0, window_bounds = array<i64: 16, 16>}, {pipeline_mode = #tpu.pipeline_mode<synchronous>, transform_indices = @transform_1, window_bounds = array<i64: 16, 128>}, {pipeline_mode = #tpu.pipeline_mode<synchronous>, transform_indices = @transform_2, window_bounds = array<i64: 1, 128>}, {pipeline_mode = #tpu.pipeline_mode<synchronous>, transform_indices = @transform_3, window_bounds = array<i64: 1, 128>}, {transform_indices = @transform_4, window_bounds = array<i64: 16, 128>}]} {
    %c16_i32 = arith.constant 16 : i32
    %0 = arith.muli %arg1, %c16_i32 : i32
    %1 = tpu.assume_multiple %0, 16 : i32
    %2 = arith.index_cast %1 : i32 to index
    %c0 = arith.constant 0 : index
    %3 = vector.load %arg3[%2, %c0] : memref<16x128xf32, #tpu.memory_space<vmem>>, vector<16x128xf32>
    %c0_0 = arith.constant 0 : index
    %c0_1 = arith.constant 0 : index
    %4 = vector.load %arg2[%c0_0, %c0_1] : memref<16x16xf32, #tpu.memory_space<vmem>>, vector<16x16xf32>
    %cst = arith.constant dense<0.000000e+00> : vector<16x128xf32>
    %5 = tpu.matmul %4, %3, %cst {dimension_numbers = #tpu.dot_dimension_numbers<[1], [0], [0], [1], [0, 0, 1, 1], [], []>} : vector<16x16xf32>, vector<16x128xf32>, vector<16x128xf32> -> vector<16x128xf32>
    %c0_i32 = arith.constant 0 : i32
    %6 = arith.cmpi eq, %arg1, %c0_i32 : i32
    %7 = arith.extui %6 : i1 to i32
    %c0_i32_2 = arith.constant 0 : i32
    %8 = arith.cmpi ne, %7, %c0_i32_2 : i32
    scf.if %8 {
      %c0_7 = arith.constant 0 : index
      %c0_8 = arith.constant 0 : index
      %15 = vector.load %arg6[%c0_7, %c0_8] : memref<16x128xf32, #tpu.memory_space<vmem>>, vector<16x128xf32>
      tpu.vector_store %arg6[%c0_7, %c0_8], %5 {strides = array<i32>} : memref<16x128xf32, #tpu.memory_space<vmem>>, vector<16x128xf32>,
    } else {
    }
    %c0_i32_3 = arith.constant 0 : i32
    %9 = arith.cmpi ne, %arg1, %c0_i32_3 : i32
    %10 = arith.extui %9 : i1 to i32
    %c0_i32_4 = arith.constant 0 : i32
    %11 = arith.cmpi ne, %10, %c0_i32_4 : i32
    scf.if %11 {
      %c0_7 = arith.constant 0 : index
      %c0_8 = arith.constant 0 : index
      %15 = vector.load %arg6[%c0_7, %c0_8] : memref<16x128xf32, #tpu.memory_space<vmem>>, vector<16x128xf32>
      %16 = arith.addf %15, %5 : vector<16x128xf32>
      %c0_9 = arith.constant 0 : index
      %c0_10 = arith.constant 0 : index
      %17 = vector.load %arg6[%c0_9, %c0_10] : memref<16x128xf32, #tpu.memory_space<vmem>>, vector<16x128xf32>
      tpu.vector_store %arg6[%c0_9, %c0_10], %16 {strides = array<i32>} : memref<16x128xf32, #tpu.memory_space<vmem>>, vector<16x128xf32>,
    } else {
    }
    %c0_i32_5 = arith.constant 0 : i32
    %12 = arith.cmpi eq, %arg1, %c0_i32_5 : i32
    %13 = arith.extui %12 : i1 to i32
    %c0_i32_6 = arith.constant 0 : i32
    %14 = arith.cmpi ne, %13, %c0_i32_6 : i32
    scf.if %14 {
      %c0_7 = arith.constant 0 : index
      %c0_8 = arith.constant 0 : index
      %15 = vector.load %arg6[%c0_7, %c0_8] : memref<16x128xf32, #tpu.memory_space<vmem>>, vector<16x128xf32>
      %c0_9 = arith.constant 0 : index
      %c0_10 = arith.constant 0 : index
      %16 = vector.load %arg4[%c0_9, %c0_10] : memref<1x128xf32, #tpu.memory_space<vmem>>, vector<1x128xf32>
      %17 = vector.broadcast %16 : vector<1x128xf32> to vector<16x128xf32>
      %18 = arith.addf %15, %17 : vector<16x128xf32>
      %c0_11 = arith.constant 0 : index
      %c0_12 = arith.constant 0 : index
      %19 = vector.load %arg5[%c0_11, %c0_12] : memref<1x128xf32, #tpu.memory_space<vmem>>, vector<1x128xf32>
      %cst_13 = arith.constant 5.000000e-01 : f32
      %20 = vector.broadcast %cst_13 : f32 to vector<1x128xf32>
      %21 = arith.cmpf ogt, %19, %20 : vector<1x128xf32>
      %cst_14 = arith.constant 0.000000e+00 : f32
      %22 = vector.broadcast %cst_14 : f32 to vector<16x128xf32>
      %23 = arith.maximumf %18, %22 : vector<16x128xf32>
      %24 = vector.shape_cast %21 : vector<1x128xi1> to vector<1x128xi1>
      %25 = vector.broadcast %24 : vector<1x128xi1> to vector<16x128xi1>
      %26 = arith.select %25, %23, %18 : vector<16x128xi1>, vector<16x128xf32>
      %c0_15 = arith.constant 0 : index
      %c0_16 = arith.constant 0 : index
      %27 = vector.load %arg6[%c0_15, %c0_16] : memref<16x128xf32, #tpu.memory_space<vmem>>, vector<16x128xf32>
      tpu.vector_store %arg6[%c0_15, %c0_16], %26 {strides = array<i32>} : memref<16x128xf32, #tpu.memory_space<vmem>>, vector<16x128xf32>,
    } else {
    }
    return
  }
  func.func @transform_0(%arg0: i32, %arg1: i32) -> (i32, i32) {
    %c0_i32 = arith.constant 0 : i32
    return %arg0, %arg1 : i32, i32
  }
  func.func @transform_1(%arg0: i32, %arg1: i32) -> (i32, i32) {
    %c0_i32 = arith.constant 0 : i32
    %c0_i32_0 = arith.constant 0 : i32
    %c0_i32_1 = arith.constant 0 : i32
    return %c0_i32, %c0_i32_0 : i32, i32
  }
  func.func @transform_2(%arg0: i32, %arg1: i32) -> (i32, i32) {
    %c0_i32 = arith.constant 0 : i32
    %c0_i32_0 = arith.constant 0 : i32
    %c0_i32_1 = arith.constant 0 : i32
    return %c0_i32, %c0_i32_0 : i32, i32
  }
  func.func @transform_3(%arg0: i32, %arg1: i32) -> (i32, i32) {
    %c0_i32 = arith.constant 0 : i32
    %c0_i32_0 = arith.constant 0 : i32
    %c0_i32_1 = arith.constant 0 : i32
    return %c0_i32, %c0_i32_0 : i32, i32
  }
  func.func @transform_4(%arg0: i32, %arg1: i32) -> (i32, i32) {
    %c0_i32 = arith.constant 0 : i32
    %c0_i32_0 = arith.constant 0 : i32
    return %arg0, %c0_i32 : i32, i32
  }
}

module attributes {stable_mosaic.version = 11 : i64} {
  func.func @_xw_kernel(%arg0: i32, %arg1: memref<16x16xf32, #tpu.memory_space<vmem>>, %arg2: memref<16x32xf32, #tpu.memory_space<vmem>>, %arg3: memref<16x32xf32, #tpu.memory_space<vmem>>) attributes {dimension_semantics = [#tpu.dimension_semantics<parallel>], iteration_bounds = array<i64: 1>, scalar_prefetch = 0 : i64, scratch_operands = 0 : i64, tpu.core_type = #tpu.core_type<tc>, window_params = [{transform_indices = @transform_0, window_bounds = array<i64: 16, 16>}, {pipeline_mode = #tpu.pipeline_mode<synchronous>, transform_indices = @transform_1, window_bounds = array<i64: 16, 32>}, {transform_indices = @transform_2, window_bounds = array<i64: 16, 32>}]} {
    %c0 = arith.constant 0 : index
    %c0_0 = arith.constant 0 : index
    %0 = vector.load %arg1[%c0, %c0_0] : memref<16x16xf32, #tpu.memory_space<vmem>>, vector<16x16xf32>
    %c0_1 = arith.constant 0 : index
    %c0_2 = arith.constant 0 : index
    %1 = vector.load %arg2[%c0_1, %c0_2] : memref<16x32xf32, #tpu.memory_space<vmem>>, vector<16x32xf32>
    %cst = arith.constant dense<0.000000e+00> : vector<16x32xf32>
    %2 = tpu.matmul %0, %1, %cst {dimension_numbers = #tpu.dot_dimension_numbers<[1], [0], [0], [1], [0, 0, 1, 1], [], []>} : vector<16x16xf32>, vector<16x32xf32>, vector<16x32xf32> -> vector<16x32xf32>
    %c0_3 = arith.constant 0 : index
    %c0_4 = arith.constant 0 : index
    %3 = vector.load %arg3[%c0_3, %c0_4] : memref<16x32xf32, #tpu.memory_space<vmem>>, vector<16x32xf32>
    tpu.vector_store %arg3[%c0_3, %c0_4], %2 {strides = array<i32>} : memref<16x32xf32, #tpu.memory_space<vmem>>, vector<16x32xf32>,
    return
  }
  func.func @transform_0(%arg0: i32) -> (i32, i32) {
    %c0_i32 = arith.constant 0 : i32
    %c0_i32_0 = arith.constant 0 : i32
    return %arg0, %c0_i32 : i32, i32
  }
  func.func @transform_1(%arg0: i32) -> (i32, i32) {
    %c0_i32 = arith.constant 0 : i32
    %c0_i32_0 = arith.constant 0 : i32
    %c0_i32_1 = arith.constant 0 : i32
    return %c0_i32, %c0_i32_0 : i32, i32
  }
  func.func @transform_2(%arg0: i32) -> (i32, i32) {
    %c0_i32 = arith.constant 0 : i32
    %c0_i32_0 = arith.constant 0 : i32
    return %arg0, %c0_i32 : i32, i32
  }
}

module attributes {stable_mosaic.version = 11 : i64} {
  func.func @_a_propagate_kernel(%arg0: i32, %arg1: i32, %arg2: memref<16x16xf32, #tpu.memory_space<vmem>>, %arg3: memref<16x256xf32, #tpu.memory_space<vmem>>, %arg4: memref<1x256xf32, #tpu.memory_space<vmem>>, %arg5: memref<1x256xf32, #tpu.memory_space<vmem>>, %arg6: memref<16x256xf32, #tpu.memory_space<vmem>>) attributes {dimension_semantics = [#tpu.dimension_semantics<parallel>, #tpu.dimension_semantics<arbitrary>], iteration_bounds = array<i64: 1, 1>, scalar_prefetch = 0 : i64, scratch_operands = 0 : i64, tpu.core_type = #tpu.core_type<tc>, window_params = [{transform_indices = @transform_0, window_bounds = array<i64: 16, 16>}, {pipeline_mode = #tpu.pipeline_mode<synchronous>, transform_indices = @transform_1, window_bounds = array<i64: 16, 256>}, {pipeline_mode = #tpu.pipeline_mode<synchronous>, transform_indices = @transform_2, window_bounds = array<i64: 1, 256>}, {pipeline_mode = #tpu.pipeline_mode<synchronous>, transform_indices = @transform_3, window_bounds = array<i64: 1, 256>}, {transform_indices = @transform_4, window_bounds = array<i64: 16, 256>}]} {
    %c16_i32 = arith.constant 16 : i32
    %0 = arith.muli %arg1, %c16_i32 : i32
    %1 = tpu.assume_multiple %0, 16 : i32
    %2 = arith.index_cast %1 : i32 to index
    %c0 = arith.constant 0 : index
    %3 = vector.load %arg3[%2, %c0] : memref<16x256xf32, #tpu.memory_space<vmem>>, vector<16x256xf32>
    %c0_0 = arith.constant 0 : index
    %c0_1 = arith.constant 0 : index
    %4 = vector.load %arg2[%c0_0, %c0_1] : memref<16x16xf32, #tpu.memory_space<vmem>>, vector<16x16xf32>
    %cst = arith.constant dense<0.000000e+00> : vector<16x256xf32>
    %5 = tpu.matmul %4, %3, %cst {dimension_numbers = #tpu.dot_dimension_numbers<[1], [0], [0], [1], [0, 0, 1, 1], [], []>} : vector<16x16xf32>, vector<16x256xf32>, vector<16x256xf32> -> vector<16x256xf32>
    %c0_i32 = arith.constant 0 : i32
    %6 = arith.cmpi eq, %arg1, %c0_i32 : i32
    %7 = arith.extui %6 : i1 to i32
    %c0_i32_2 = arith.constant 0 : i32
    %8 = arith.cmpi ne, %7, %c0_i32_2 : i32
    scf.if %8 {
      %c0_7 = arith.constant 0 : index
      %c0_8 = arith.constant 0 : index
      %15 = vector.load %arg6[%c0_7, %c0_8] : memref<16x256xf32, #tpu.memory_space<vmem>>, vector<16x256xf32>
      tpu.vector_store %arg6[%c0_7, %c0_8], %5 {strides = array<i32>} : memref<16x256xf32, #tpu.memory_space<vmem>>, vector<16x256xf32>,
    } else {
    }
    %c0_i32_3 = arith.constant 0 : i32
    %9 = arith.cmpi ne, %arg1, %c0_i32_3 : i32
    %10 = arith.extui %9 : i1 to i32
    %c0_i32_4 = arith.constant 0 : i32
    %11 = arith.cmpi ne, %10, %c0_i32_4 : i32
    scf.if %11 {
      %c0_7 = arith.constant 0 : index
      %c0_8 = arith.constant 0 : index
      %15 = vector.load %arg6[%c0_7, %c0_8] : memref<16x256xf32, #tpu.memory_space<vmem>>, vector<16x256xf32>
      %16 = arith.addf %15, %5 : vector<16x256xf32>
      %c0_9 = arith.constant 0 : index
      %c0_10 = arith.constant 0 : index
      %17 = vector.load %arg6[%c0_9, %c0_10] : memref<16x256xf32, #tpu.memory_space<vmem>>, vector<16x256xf32>
      tpu.vector_store %arg6[%c0_9, %c0_10], %16 {strides = array<i32>} : memref<16x256xf32, #tpu.memory_space<vmem>>, vector<16x256xf32>,
    } else {
    }
    %c0_i32_5 = arith.constant 0 : i32
    %12 = arith.cmpi eq, %arg1, %c0_i32_5 : i32
    %13 = arith.extui %12 : i1 to i32
    %c0_i32_6 = arith.constant 0 : i32
    %14 = arith.cmpi ne, %13, %c0_i32_6 : i32
    scf.if %14 {
      %c0_7 = arith.constant 0 : index
      %c0_8 = arith.constant 0 : index
      %15 = vector.load %arg6[%c0_7, %c0_8] : memref<16x256xf32, #tpu.memory_space<vmem>>, vector<16x256xf32>
      %c0_9 = arith.constant 0 : index
      %c0_10 = arith.constant 0 : index
      %16 = vector.load %arg4[%c0_9, %c0_10] : memref<1x256xf32, #tpu.memory_space<vmem>>, vector<1x256xf32>
      %17 = vector.broadcast %16 : vector<1x256xf32> to vector<16x256xf32>
      %18 = arith.addf %15, %17 : vector<16x256xf32>
      %c0_11 = arith.constant 0 : index
      %c0_12 = arith.constant 0 : index
      %19 = vector.load %arg5[%c0_11, %c0_12] : memref<1x256xf32, #tpu.memory_space<vmem>>, vector<1x256xf32>
      %cst_13 = arith.constant 5.000000e-01 : f32
      %20 = vector.broadcast %cst_13 : f32 to vector<1x256xf32>
      %21 = arith.cmpf ogt, %19, %20 : vector<1x256xf32>
      %cst_14 = arith.constant 0.000000e+00 : f32
      %22 = vector.broadcast %cst_14 : f32 to vector<16x256xf32>
      %23 = arith.maximumf %18, %22 : vector<16x256xf32>
      %24 = vector.shape_cast %21 : vector<1x256xi1> to vector<1x256xi1>
      %25 = vector.broadcast %24 : vector<1x256xi1> to vector<16x256xi1>
      %26 = arith.select %25, %23, %18 : vector<16x256xi1>, vector<16x256xf32>
      %c0_15 = arith.constant 0 : index
      %c0_16 = arith.constant 0 : index
      %27 = vector.load %arg6[%c0_15, %c0_16] : memref<16x256xf32, #tpu.memory_space<vmem>>, vector<16x256xf32>
      tpu.vector_store %arg6[%c0_15, %c0_16], %26 {strides = array<i32>} : memref<16x256xf32, #tpu.memory_space<vmem>>, vector<16x256xf32>,
    } else {
    }
    return
  }
  func.func @transform_0(%arg0: i32, %arg1: i32) -> (i32, i32) {
    %c0_i32 = arith.constant 0 : i32
    return %arg0, %arg1 : i32, i32
  }
  func.func @transform_1(%arg0: i32, %arg1: i32) -> (i32, i32) {
    %c0_i32 = arith.constant 0 : i32
    %c0_i32_0 = arith.constant 0 : i32
    %c0_i32_1 = arith.constant 0 : i32
    return %c0_i32, %c0_i32_0 : i32, i32
  }
  func.func @transform_2(%arg0: i32, %arg1: i32) -> (i32, i32) {
    %c0_i32 = arith.constant 0 : i32
    %c0_i32_0 = arith.constant 0 : i32
    %c0_i32_1 = arith.constant 0 : i32
    return %c0_i32, %c0_i32_0 : i32, i32
  }
  func.func @transform_3(%arg0: i32, %arg1: i32) -> (i32, i32) {
    %c0_i32 = arith.constant 0 : i32
    %c0_i32_0 = arith.constant 0 : i32
    %c0_i32_1 = arith.constant 0 : i32
    return %c0_i32, %c0_i32_0 : i32, i32
  }
  func.func @transform_4(%arg0: i32, %arg1: i32) -> (i32, i32) {
    %c0_i32 = arith.constant 0 : i32
    %c0_i32_0 = arith.constant 0 : i32
    return %arg0, %c0_i32 : i32, i32
  }
}

module attributes {stable_mosaic.version = 11 : i64} {
  func.func @_xw_kernel(%arg0: i32, %arg1: memref<16x32xf32, #tpu.memory_space<vmem>>, %arg2: memref<32x8xf32, #tpu.memory_space<vmem>>, %arg3: memref<16x8xf32, #tpu.memory_space<vmem>>) attributes {dimension_semantics = [#tpu.dimension_semantics<parallel>], iteration_bounds = array<i64: 1>, scalar_prefetch = 0 : i64, scratch_operands = 0 : i64, tpu.core_type = #tpu.core_type<tc>, window_params = [{transform_indices = @transform_0, window_bounds = array<i64: 16, 32>}, {pipeline_mode = #tpu.pipeline_mode<synchronous>, transform_indices = @transform_1, window_bounds = array<i64: 32, 8>}, {transform_indices = @transform_2, window_bounds = array<i64: 16, 8>}]} {
    %c0 = arith.constant 0 : index
    %c0_0 = arith.constant 0 : index
    %0 = vector.load %arg1[%c0, %c0_0] : memref<16x32xf32, #tpu.memory_space<vmem>>, vector<16x32xf32>
    %c0_1 = arith.constant 0 : index
    %c0_2 = arith.constant 0 : index
    %1 = vector.load %arg2[%c0_1, %c0_2] : memref<32x8xf32, #tpu.memory_space<vmem>>, vector<32x8xf32>
    %cst = arith.constant dense<0.000000e+00> : vector<16x8xf32>
    %2 = tpu.matmul %0, %1, %cst {dimension_numbers = #tpu.dot_dimension_numbers<[1], [0], [0], [1], [0, 0, 1, 1], [], []>} : vector<16x32xf32>, vector<32x8xf32>, vector<16x8xf32> -> vector<16x8xf32>
    %c0_3 = arith.constant 0 : index
    %c0_4 = arith.constant 0 : index
    %3 = vector.load %arg3[%c0_3, %c0_4] : memref<16x8xf32, #tpu.memory_space<vmem>>, vector<16x8xf32>
    tpu.vector_store %arg3[%c0_3, %c0_4], %2 {strides = array<i32>} : memref<16x8xf32, #tpu.memory_space<vmem>>, vector<16x8xf32>,
    return
  }
  func.func @transform_0(%arg0: i32) -> (i32, i32) {
    %c0_i32 = arith.constant 0 : i32
    %c0_i32_0 = arith.constant 0 : i32
    return %arg0, %c0_i32 : i32, i32
  }
  func.func @transform_1(%arg0: i32) -> (i32, i32) {
    %c0_i32 = arith.constant 0 : i32
    %c0_i32_0 = arith.constant 0 : i32
    %c0_i32_1 = arith.constant 0 : i32
    return %c0_i32, %c0_i32_0 : i32, i32
  }
  func.func @transform_2(%arg0: i32) -> (i32, i32) {
    %c0_i32 = arith.constant 0 : i32
    %c0_i32_0 = arith.constant 0 : i32
    return %arg0, %c0_i32 : i32, i32
  }
}

module attributes {stable_mosaic.version = 11 : i64} {
  func.func @_dot_decoder_kernel(%arg0: i32, %arg1: i32, %arg2: memref<16x32xf32, #tpu.memory_space<vmem>>, %arg3: memref<16x32xf32, #tpu.memory_space<vmem>>, %arg4: memref<16x16xf32, #tpu.memory_space<vmem>>) attributes {dimension_semantics = [#tpu.dimension_semantics<parallel>, #tpu.dimension_semantics<parallel>], iteration_bounds = array<i64: 1, 1>, scalar_prefetch = 0 : i64, scratch_operands = 0 : i64, tpu.core_type = #tpu.core_type<tc>, window_params = [{transform_indices = @transform_0, window_bounds = array<i64: 16, 32>}, {transform_indices = @transform_1, window_bounds = array<i64: 16, 32>}, {transform_indices = @transform_2, window_bounds = array<i64: 16, 16>}]} {
    %c0 = arith.constant 0 : index
    %c0_0 = arith.constant 0 : index
    %0 = vector.load %arg2[%c0, %c0_0] : memref<16x32xf32, #tpu.memory_space<vmem>>, vector<16x32xf32>
    %c0_1 = arith.constant 0 : index
    %c0_2 = arith.constant 0 : index
    %1 = vector.load %arg3[%c0_1, %c0_2] : memref<16x32xf32, #tpu.memory_space<vmem>>, vector<16x32xf32>
    %cst = arith.constant dense<0.000000e+00> : vector<16x16xf32>
    %2 = tpu.matmul %0, %1, %cst {dimension_numbers = #tpu.dot_dimension_numbers<[1], [1], [0], [0], [0, 0, 1, 0], [], []>} : vector<16x32xf32>, vector<16x32xf32>, vector<16x16xf32> -> vector<16x16xf32>
    %c0_3 = arith.constant 0 : index
    %c0_4 = arith.constant 0 : index
    %3 = vector.load %arg4[%c0_3, %c0_4] : memref<16x16xf32, #tpu.memory_space<vmem>>, vector<16x16xf32>
    tpu.vector_store %arg4[%c0_3, %c0_4], %2 {strides = array<i32>} : memref<16x16xf32, #tpu.memory_space<vmem>>, vector<16x16xf32>,
    return
  }
  func.func @transform_0(%arg0: i32, %arg1: i32) -> (i32, i32) {
    %c0_i32 = arith.constant 0 : i32
    %c0_i32_0 = arith.constant 0 : i32
    return %arg0, %c0_i32 : i32, i32
  }
  func.func @transform_1(%arg0: i32, %arg1: i32) -> (i32, i32) {
    %c0_i32 = arith.constant 0 : i32
    %c0_i32_0 = arith.constant 0 : i32
    return %arg1, %c0_i32 : i32, i32
  }
  func.func @transform_2(%arg0: i32, %arg1: i32) -> (i32, i32) {
    %c0_i32 = arith.constant 0 : i32
    return %arg0, %arg1 : i32, i32
  }
}

</mosaic_0001>

<bundles_post_ra>
// kernel: dominant_forward.18
= control target key start
LH: loop header
LB: loop body
LE: loop exit
PB: predicated region body
PF: predicated region fallthrough
CT: control target
= control target key end

     0   :  { %vm14_vm0 = vcmask 64512   ;;  %vm96_vm1 = vcmask 261120   ;;  %s143_s1 = inlined_call_operand.vmem [shape: f32[8,32], index: 1, kind: input, shape index: {}]   ;;  %s144_s0 = inlined_call_operand.vmem [shape: f32[16,8], index: 0, kind: input, shape index: {}]   ;;  %s145_s2 = inlined_call_operand.vmem [shape: f32[16,32], index: 2, kind: output, shape index: {}]  }
   0x1   :  { %v13_v0 = vld [vmem:[%s143_s1] sm:$0xff]  ;;  %v12_v2 = vld [vmem:[%s144_s0 + $0x8] sm:$0xff] }
   0x2   :  { %v11_v1 = vld [vmem:[%s144_s0] sm:$0xff]  ;;  %108 = vmatprep.subr.mxu0 %v13_v0 }
   0x3   :  { %110 = vmatprep.mubr.msk.f32.mxu0 %vm14_vm0, %v11_v1  ;;  %109 = vmatpush3.msra.mxu0 %v13_v0 }
   0x4   :  { %111 = vmatmul.mubr.msk.f32.vlgmr.msra.gmra.mxu0 %vm14_vm0, %v12_v2 }
  0xc4   :  { %v112_v3 = vpop.f32.mrf.mxu0 }
  0xc5   :  { %98 = vst.msk [vmem:[%s145_s2 + $0x8] sm:$0xff] %vm96_vm1, %v112_v3 }
  0xc6   :  { %v87_v4 = vpop.f32.mrf.mxu0 }
  0xc7   :  { %97 = vst.msk [vmem:[%s145_s2] sm:$0xff] %vm96_vm1, %v87_v4 }

// kernel: dominant_forward.21
= control target key start
LH: loop header
LB: loop body
LE: loop exit
PB: predicated region body
PF: predicated region fallthrough
CT: control target
= control target key end

     0   :  { %vm17_vm0 = vcmask 261120   ;;  %s167_s1 = inlined_call_operand.vmem [shape: f32[32,32], index: 1, kind: input, shape index: {}]   ;;  %s168_s0 = inlined_call_operand.vmem [shape: f32[16,32], index: 0, kind: input, shape index: {}]   ;;  %s169_s2 = inlined_call_operand.vmem [shape: f32[16,32], index: 2, kind: output, shape index: {}]  }
   0x1   :  { %v16_v0 = vld [vmem:[%s167_s1 + $0x18] sm:$0xff]  ;;  %v15_v1 = vld [vmem:[%s167_s1 + $0x10] sm:$0xff]  ;;  %v11_v2 = vld [vmem:[%s168_s0] sm:$0xff] }
   0x2   :  { %113 = vmatprep.subr.mxu0 %v16_v0  ;;  %v14_v3 = vld [vmem:[%s167_s1 + $0x8] sm:$0xff]  ;;  %121 = vmatprep.mubr.msk.f32.mxu0 %vm17_vm0, %v11_v2  ;;  %v13_v4 = vld [vmem:[%s167_s1] sm:$0xff] }
   0x3   :  { %114 = vmatpush3.msra.mxu0 %v16_v0  ;;  %v12_v5 = vld [vmem:[%s168_s0 + $0x8] sm:$0xff] }
   0x4   :  { %115 = vmatprep.subr.mxu0 %v15_v1 }
   0x5   :  { %116 = vmatpush3.msra.mxu0 %v15_v1 }
   0x6   :  { %117 = vmatprep.subr.mxu0 %v14_v3 }
   0x7   :  { %118 = vmatpush3.msra.mxu0 %v14_v3 }
   0x8   :  { %119 = vmatprep.subr.mxu0 %v13_v4 }
   0x9   :  { %120 = vmatpush3.msra.mxu0 %v13_v4 }
   0xa   :  { %122 = vmatmul.mubr.msk.f32.vlgmr.msra.gmra.mxu0 %vm17_vm0, %v12_v5 }
  0xca   :  { %v123_v6 = vpop.f32.mrf.mxu0 }
  0xcb   :  { %100 = vst.msk [vmem:[%s169_s2 + $0x8] sm:$0xff] %vm17_vm0, %v123_v6 }
  0xcc   :  { %v90_v7 = vpop.f32.mrf.mxu0 }
  0xcd   :  { %99 = vst.msk [vmem:[%s169_s2] sm:$0xff] %vm17_vm0, %v90_v7 }

// kernel: dominant_forward.20
= control target key start
LH: loop header
LB: loop body
LE: loop exit
PB: predicated region body
PF: predicated region fallthrough
CT: control target
= control target key end

     0   :  { %vm23_vm0 = vcmask 130048   ;;  %v140_v4 = vlaneseq  ;;  %v168_v8 = vmov 0   ;;  %s218_s1 = inlined_call_operand.vmem [shape: f32[16,128], index: 1, kind: input, shape index: {}]   ;;  %s219_s0 = inlined_call_operand.vmem [shape: f32[16,16], index: 0, kind: input, shape index: {}]   ;;  %s220_s3 = inlined_call_operand.vmem [shape: f32[1,128], index: 3, kind: input, shape index: {}]   ;;  %s221_s2 = inlined_call_operand.vmem [shape: f32[1,128], index: 2, kind: input, shape index: {}]   ;;  %s222_s4 = inlined_call_operand.vmem [shape: f32[16,128], index: 4, kind: output, shape index: {}]  }
   0x1   :  { %v20_v0 = vld [vmem:[%s218_s1 + $0x8] sm:$0xff]  ;;  %v19_v1 = vld [vmem:[%s218_s1] sm:$0xff] }
   0x2   :  { %v21_v2 = vld [vmem:[%s219_s0] sm:$0xff]  ;;  %160 = vmatprep.subr.mxu0 %v20_v0  ;;  %v22_v3 = vld [vmem:[%s219_s0 + $0x8] sm:$0xff]  ;;  %v141_v6 = vshrl.u32 %v140_v4, 7 }
   0x3   :  { %164 = vmatprep.mubr.msk.f32.mxu0 %vm23_vm0, %v21_v2  ;;  %161 = vmatpush3.msra.mxu0 %v20_v0  ;;  %v135_v5 = vld [vmem:[%s220_s3] sm:$0x1] }
   0x4   :  { %162 = vmatprep.subr.mxu0 %v19_v1  ;;  %vm136_vm1 = vcmp.gt.f32.partialorder %v135_v5, 0.5  ;;  %v142_v7 = vsub.s32 0, %v141_v6  ;;  %v155_v10 = vld [vmem:[%s221_s2] ss:$0 sm:$0xff] }
   0x5   :  { %163 = vmatpush3.msra.mxu0 %v19_v1  ;;  %v139_v9 = vsel %vm136_vm1, 1, %v168_v8 }
   0x6   :  { %165 = vmatmul.mubr.msk.f32.vlgmr.msra.gmra.mxu0 %vm23_vm0, %v22_v3  ;;  %v143_v11 = vrot.slane %v139_v9, %v142_v7 }
   0x8   :  { %vm144_vm2 = vcmp.eq.s32.totalorder %v143_v11, 1 }
  0xc6   :  { %v166_v12 = vpop.f32.mrf.mxu0 }
  0xc7   :  { %v134_v13 = vadd.f32 %v166_v12, %v155_v10 }
  0xc8   :  { %v96_v14 = vpop.f32.mrf.mxu0 }
  0xc9   :  { %v138_v15 = vmax.f32 %v134_v13, 0.0  ;;  %v133_v16 = vadd.f32 %v155_v10, %v96_v14 }
  0xcb   :  { %v146_v17 = vsel %vm144_vm2, %v138_v15, %v134_v13  ;;  %v137_v18 = vmax.f32 %v133_v16, 0.0 }
  0xcc   :  { %148 = vst [vmem:[%s222_s4 + $0x8] sm:$0xff] %v146_v17 }
  0xcd   :  { %v145_v19 = vsel %vm144_vm2, %v137_v18, %v133_v16 }
  0xce   :  { %147 = vst [vmem:[%s222_s4] sm:$0xff] %v145_v19 }

// kernel: dominant_forward.28
= control target key start
LH: loop header
LB: loop body
LE: loop exit
PB: predicated region body
PF: predicated region fallthrough
CT: control target
= control target key end

     0   :  { %vm15_vm0 = vcmask 130048   ;;  %vm97_vm1 = vcmask 261120   ;;  %s150_s1 = inlined_call_operand.vmem [shape: f32[16,32], index: 1, kind: input, shape index: {}]   ;;  %s151_s0 = inlined_call_operand.vmem [shape: f32[16,16], index: 0, kind: input, shape index: {}]   ;;  %s152_s2 = inlined_call_operand.vmem [shape: f32[16,32], index: 2, kind: output, shape index: {}]  }
   0x1   :  { %v14_v0 = vld [vmem:[%s150_s1 + $0x8] sm:$0xff]  ;;  %v13_v1 = vld [vmem:[%s150_s1] sm:$0xff] }
   0x2   :  { %v11_v2 = vld [vmem:[%s151_s0] sm:$0xff]  ;;  %110 = vmatprep.subr.mxu0 %v14_v0  ;;  %v12_v3 = vld [vmem:[%s151_s0 + $0x8] sm:$0xff] }
   0x3   :  { %114 = vmatprep.mubr.msk.f32.mxu0 %vm15_vm0, %v11_v2  ;;  %111 = vmatpush3.msra.mxu0 %v14_v0 }
   0x4   :  { %112 = vmatprep.subr.mxu0 %v13_v1 }
   0x5   :  { %113 = vmatpush3.msra.mxu0 %v13_v1 }
   0x6   :  { %115 = vmatmul.mubr.msk.f32.vlgmr.msra.gmra.mxu0 %vm15_vm0, %v12_v3 }
  0xc6   :  { %v116_v4 = vpop.f32.mrf.mxu0 }
  0xc7   :  { %99 = vst.msk [vmem:[%s152_s2 + $0x8] sm:$0xff] %vm97_vm1, %v116_v4 }
  0xc8   :  { %v88_v5 = vpop.f32.mrf.mxu0 }
  0xc9   :  { %98 = vst.msk [vmem:[%s152_s2] sm:$0xff] %vm97_vm1, %v88_v5 }

// kernel: dominant_forward.29
= control target key start
LH: loop header
LB: loop body
LE: loop exit
PB: predicated region body
PF: predicated region fallthrough
CT: control target
= control target key end

     0   :  { %v199_v3 = vmov 0.0   ;;  %vm29_vm0 = vcmask 130048   ;;  %v146_v7 = vlaneseq  ;;  %v200_v12 = vmov 0   ;;  %s262_s1 = inlined_call_operand.vmem [shape: f32[16,256], index: 1, kind: input, shape index: {}]   ;;  %s263_s0 = inlined_call_operand.vmem [shape: f32[16,16], index: 0, kind: input, shape index: {}]   ;;  %s264_s3 = inlined_call_operand.vmem [shape: f32[1,256], index: 3, kind: input, shape index: {}]   ;;  %s265_s2 = inlined_call_operand.vmem [shape: f32[1,256], index: 2, kind: input, shape index: {}]   ;;  %s266_s4 = inlined_call_operand.vmem [shape: f32[16,256], index: 4, kind: output, shape index: {}]  }
   0x1   :  { %v26_v0 = vld [vmem:[%s262_s1 + $0x18] sm:$0xff]  ;;  %v25_v1 = vld [vmem:[%s262_s1 + $0x10] sm:$0xff]  ;;  %v24_v2 = vld [vmem:[%s262_s1 + $0x8] sm:$0xff]  ;;  %100 = vmatprep.mubr.f32.mxu0 %v199_v3  ;;  %106 = vmatprep.mubr.f32.mxu1 %v199_v3 }
   0x2   :  { %64 = vmatprep.subr.mxu0 %v26_v0  ;;  %193 = vmatprep.subr.mxu1 %v26_v0  ;;  %v23_v4 = vld [vmem:[%s262_s1] sm:$0xff]  ;;  %v28_v6 = vld [vmem:[%s263_s0 + $0x8] sm:$0xff]  ;;  %v147_v8 = vshrl.u32 %v146_v7, 7 }
   0x3   :  { %65 = vmatpush1.msra.mxu0 %v25_v1  ;;  %195 = vmatpush1.msra.mxu1 %v25_v1  ;;  %v27_v5 = vld [vmem:[%s263_s0] sm:$0xff] }
   0x4   :  { %66 = vmatprep.subr.mxu0 %v24_v2  ;;  %194 = vmatprep.subr.mxu1 %v24_v2  ;;  %v160_v9 = vld [vmem:[%s264_s3] sm:$0x3]  ;;  %v148_v10 = vsub.s32 0, %v147_v8  ;;  %v152_v14 = vsub.s32 1, %v147_v8 }
   0x5   :  { %67 = vmatpush1.msra.mxu0 %v23_v4  ;;  %196 = vmatpush1.msra.mxu1 %v23_v4  ;;  %vm161_vm1 = vcmp.gt.f32.partialorder %v160_v9, 0.5  ;;  %v144_v11 = vld [vmem:[%s265_s2] sm:$0x3] }
   0x6   :  { %191 = vmatmul.mubr.msk.f32.vlgmr.msra.gmra.mxu0 %vm29_vm0, %v27_v5  ;;  %192 = vmatmul.mubr.msk.f32.vlgmr.msra.gmra.mxu1 %vm29_vm0, %v28_v6  ;;  %v166_v13 = vsel %vm161_vm1, 1, %v200_v12  ;;  %v149_v15 = vrot.slane %v144_v11, %v148_v10  ;;  %v153_v17 = vrot.slane %v144_v11, %v152_v14 }
   0x7   :  { %v170_v16 = vrot.slane %v166_v13, %v148_v10  ;;  %v174_v20 = vrot.slane %v166_v13, %v152_v14 }
   0x9   :  { %vm175_vm2 = vcmp.eq.s32.totalorder %v170_v16, 1  ;;  %vm176_vm3 = vcmp.eq.s32.totalorder %v174_v20, 1 }
  0xc6   :  { %v102_v18 = vpop.f32.mrf.mxu0  ;;  %v108_v19 = vpop.f32.mrf.mxu1 }
  0xc7   :  { %v156_v21 = vadd.f32 %v149_v15, %v102_v18  ;;  %v158_v22 = vadd.f32 %v149_v15, %v108_v19 }
  0xc8   :  { %v104_v23 = vpop.f32.mrf.mxu0  ;;  %v110_v24 = vpop.f32.mrf.mxu1 }
  0xc9   :  { %v162_v25 = vmax.f32 %v156_v21, 0.0  ;;  %v164_v26 = vmax.f32 %v158_v22, 0.0  ;;  %v157_v27 = vadd.f32 %v153_v17, %v104_v23  ;;  %v159_v28 = vadd.f32 %v153_v17, %v110_v24 }
  0xcb   :  { %v177_v29 = vsel %vm175_vm2, %v162_v25, %v156_v21  ;;  %v179_v30 = vsel %vm175_vm2, %v164_v26, %v158_v22  ;;  %v163_v31 = vmax.f32 %v157_v27, 0.0  ;;  %v165_v32 = vmax.f32 %v159_v28, 0.0 }
  0xcc   :  { %181 = vst [vmem:[%s266_s4] sm:$0xff] %v177_v29  ;;  %183 = vst [vmem:[%s266_s4 + $0x10] sm:$0xff] %v179_v30 }
  0xcd   :  { %v178_v33 = vsel %vm176_vm3, %v163_v31, %v157_v27  ;;  %v180_v34 = vsel %vm176_vm3, %v165_v32, %v159_v28 }
  0xce   :  { %182 = vst [vmem:[%s266_s4 + $0x8] sm:$0xff] %v178_v33  ;;  %184 = vst [vmem:[%s266_s4 + $0x18] sm:$0xff] %v180_v34 }

// kernel: dominant_forward.30
= control target key start
LH: loop header
LB: loop body
LE: loop exit
PB: predicated region body
PF: predicated region fallthrough
CT: control target
= control target key end

     0   :  { %vm17_vm0 = vcmask 261120   ;;  %vm99_vm1 = vcmask 64512   ;;  %s166_s1 = inlined_call_operand.vmem [shape: f32[32,8], index: 1, kind: input, shape index: {}]   ;;  %s167_s0 = inlined_call_operand.vmem [shape: f32[16,32], index: 0, kind: input, shape index: {}]   ;;  %s168_s2 = inlined_call_operand.vmem [shape: f32[16,8], index: 2, kind: output, shape index: {}]  }
   0x1   :  { %v16_v0 = vld [vmem:[%s166_s1 + $0x18] sm:$0xff]  ;;  %v15_v1 = vld [vmem:[%s166_s1 + $0x10] sm:$0xff]  ;;  %v11_v2 = vld [vmem:[%s167_s0] sm:$0xff] }
   0x2   :  { %114 = vmatprep.subr.mxu0 %v16_v0  ;;  %v14_v3 = vld [vmem:[%s166_s1 + $0x8] sm:$0xff]  ;;  %122 = vmatprep.mubr.msk.f32.mxu0 %vm17_vm0, %v11_v2  ;;  %v13_v4 = vld [vmem:[%s166_s1] sm:$0xff] }
   0x3   :  { %115 = vmatpush3.msra.mxu0 %v16_v0  ;;  %v12_v5 = vld [vmem:[%s167_s0 + $0x8] sm:$0xff] }
   0x4   :  { %116 = vmatprep.subr.mxu0 %v15_v1 }
   0x5   :  { %117 = vmatpush3.msra.mxu0 %v15_v1 }
   0x6   :  { %118 = vmatprep.subr.mxu0 %v14_v3 }
   0x7   :  { %119 = vmatpush3.msra.mxu0 %v14_v3 }
   0x8   :  { %120 = vmatprep.subr.mxu0 %v13_v4 }
   0x9   :  { %121 = vmatpush3.msra.mxu0 %v13_v4 }
   0xa   :  { %123 = vmatmul.mubr.msk.f32.vlgmr.msra.gmra.mxu0 %vm17_vm0, %v12_v5 }
  0xca   :  { %v124_v6 = vpop.f32.mrf.mxu0 }
  0xcb   :  { %101 = vst.msk [vmem:[%s168_s2 + $0x8] sm:$0xff] %vm99_vm1, %v124_v6 }
  0xcc   :  { %v90_v7 = vpop.f32.mrf.mxu0 }
  0xcd   :  { %100 = vst.msk [vmem:[%s168_s2] sm:$0xff] %vm99_vm1, %v90_v7 }

// kernel: dominant_forward.35
= control target key start
LH: loop header
LB: loop body
LE: loop exit
PB: predicated region body
PF: predicated region fallthrough
CT: control target
= control target key end

     0   :  { %vm16_vm0 = vcmask 261120   ;;  %s196_s0 = inlined_call_operand.vmem [shape: f32[16,32], index: 0, kind: input, shape index: {}, may-alias: {0,1}]   ;;  %s197_s1 = inlined_call_operand.vmem [shape: f32[16,32], index: 1, kind: input, shape index: {}, may-alias: {0,1}]   ;;  %s198_s2 = inlined_call_operand.hbm [shape: f32[16,16], index: 2, kind: output, shape index: {}]  }
   0x1   :  { %v15_v0 = vld [vmem:[%s197_s1 + $0x8] sm:$0xff]  ;;  %v14_v1 = vld [vmem:[%s197_s1] sm:$0xff] }
   0x2   :  { %v12_v2 = vld [vmem:[%s196_s0] sm:$0xff]  ;;  %131 = vmatprep.subr.msk.mxu0 %vm16_vm0, %v15_v0 }
   0x3   :  { %135 = vmatprep.mubr.msk.f32.mxu0 %vm16_vm0, %v12_v2 }
   0x4   :  { %7 = vsyncpa [#allocation3], 0  ;;  %132 = vmatpush3.xpose.msk.msra.mxu0 %vm16_vm0, %v15_v0  ;;  %v13_v3 = vld [vmem:[%s196_s0 + $0x8] sm:$0xff]  ;;  %s163_s17 = smov [#allocation2]   ;;  %vm104_vm1 = vcmask 130048  }
   0x5   :  { %133 = vmatprep.subr.msk.mxu0 %vm16_vm0, %v14_v1  ;;  %s112_s18 = sshll.u32 %s163_s17, 4  ;;  %s113_s18 = int_to_ptr.vmem [resolvable:$true] %s112_s18 }
   0x6   :  { %s141_s1 = scalar_lea.vmem %s113_s18, 256  ;;  %p146_p1 = scmp.lt.s32.totalorder %s113_s18, %s113_s18 }
   0x7   :  { %p142_p0 = scmp.ne.s32.totalorder %s113_s18, %s141_s1  ;;  %p147_p2 = scmp.lt.s32.totalorder %s141_s1, %s141_s1 }
   0x8   :  { %134 = vmatpush3.xpose.msk.msra.mxu0 %vm16_vm0, %v14_v1 }
   0x9   :  { %p148_p3 = por %p147_p2, %p146_p1 }
   0xb   :  { %136 = vmatmul.mubr.msk.f32.vlgmr.msra.gmra.mxu0 %vm16_vm0, %v13_v3  ;;  %p149_p4 = pnand %p148_p3, %p142_p0 }
  0xcb   :  { %v137_v4 = vpop.f32.mrf.mxu0 }
  0xcc   :  { %106 = vst.msk [vmem:[#allocation2 + $0x8] sm:$0xff] %vm104_vm1, %v137_v4 }
  0xcd   :  { %v95_v5 = vpop.f32.mrf.mxu0 }
  0xce   :  { %105 = vst.msk [vmem:[#allocation2] sm:$0xff] %vm104_vm1, %v95_v5 }
  0xcf   :  { %152 = shalt.err (!%p149_p4)
}
  0xd0   :  { %s164_s19 = smov 128   ;;  %s165_s20 = smov 8  }
  0xd1   :  { %118 = dma.vmem_to_hbm [thread:$0]  %s113_s18, 256, %s198_s2, [#allocation3], %s164_s19, %s164_s19, %s165_s20  }
  0xd2   :  { %161 = dma.done.wait [#allocation3], 256  }
  0xd3   :  { %162 = vsyncadd [#allocation3], 4294967040 }
  0xd4   :  { %122 = vsyncpa [#allocation3], 1 }

</bundles_post_ra>
